<compile_context>
chip_gen: v7x
topology: tpu7x:2x2x1
jax: 0.10.0
libtpu: 0.0.40
codegen_flags: <defaults>
</compile_context>

<pallas_src>
import functools

import jax
import jax.numpy as jnp
from jax.experimental import pallas as pl
from jax.experimental.pallas import tpu as pltpu


def _round_up(n, m):
  return ((n + m - 1) // m) * m


def _ffn_kernel(x_ref, w1_ref, b1_ref, w2_ref, b2_ref, o_ref):
  """One (tm, d_model) row block:  o = relu(x @ w1 + b1) @ w2 + b2."""
  x = x_ref[...]                                        # (tm, D), f32

  # Linear 1: bf16 MXU operands, f32 accumulation.
  h = jnp.dot(x.astype(jnp.bfloat16), w1_ref[...],
              preferred_element_type=jnp.float32)       # (tm, d_ff)
  h = jnp.maximum(h + b1_ref[...], 0.0)                 # bias + ReLU in f32 (VPU)

  # TODO(synk): dropout is identity here (inference semantics).

  # Linear 2: bf16 MXU operands, f32 accumulation.
  y = jnp.dot(h.astype(jnp.bfloat16), w2_ref[...],
              preferred_element_type=jnp.float32)       # (tm, D)
  o_ref[...] = (y + b2_ref[...]).astype(o_ref.dtype)


def positionwise_ffn_pallas(x, params, *, block_rows=128):
  """x: (..., d_model) float32. params: dict from init_params (w1/w2 bf16, b1/b2 f32)."""
  orig_shape = x.shape
  D = orig_shape[-1]
  d_ff = params["w1"].shape[1]
  assert params["w1"].shape[0] == D and params["w2"].shape == (d_ff, D)

  # Flatten all leading dims into a single row axis (lane-dense last dim stays D).
  x2 = x.reshape(-1, D)
  M = x2.shape[0]

  # Row tile: multiple of 8 (sublane), capped by the (padded) number of rows.
  tm = max(8, min(int(block_rows), _round_up(M, 8)))
  tm = _round_up(tm, 8)
  Mp = _round_up(M, tm)
  if Mp != M:
    x2 = jnp.pad(x2, ((0, Mp - M), (0, 0)))
  grid = (Mp // tm,)

  # Explicit VMEM budget (v7x has only 64 MiB physical VMEM).
  wbytes, abytes = 2, 4
  est = (2 * (D * d_ff + d_ff * D) * wbytes        # double-buffered bf16 weights
         + 2 * (d_ff + D) * abytes                 # double-buffered f32 biases
         + 2 * 2 * tm * D * abytes                 # double-buffered x / out row tiles
         + tm * d_ff * abytes + tm * D * abytes)   # live f32 intermediates
  vmem_limit = int(min(max(2 * est, 8 << 20), 64 << 20))

  const = lambda i: (0, 0)  # weights/biases: fetched once, reused every step
  in_specs = [
      pl.BlockSpec((tm, D), lambda i: (i, 0)),     # x row tile
      pl.BlockSpec((D, d_ff), const),              # w1 (bf16)
      pl.BlockSpec((1, d_ff), const),              # b1 (f32)
      pl.BlockSpec((d_ff, D), const),              # w2 (bf16)
      pl.BlockSpec((1, D), const),                 # b2 (f32)
  ]
  out_specs = pl.BlockSpec((tm, D), lambda i: (i, 0))

  out = pl.pallas_call(
      _ffn_kernel,
      out_shape=jax.ShapeDtypeStruct((Mp, D), x.dtype),
      grid_spec=pltpu.PrefetchScalarGridSpec(
          num_scalar_prefetch=0,
          grid=grid,
          in_specs=in_specs,
          out_specs=out_specs,
      ),
      compiler_params=pltpu.CompilerParams(
          dimension_semantics=("parallel",),
          vmem_limit_bytes=vmem_limit,
      ),
  )(x2, params["w1"], params["b1"], params["w2"], params["b2"])

  return out[:M].reshape(orig_shape)


def positionwise_ffn_ref(x, params):
  """Pure-JAX reference with the same bf16-operand / f32-accumulate math."""
  D = x.shape[-1]
  x2 = x.reshape(-1, D)
  h = jnp.dot(x2.astype(jnp.bfloat16), params["w1"],
              preferred_element_type=jnp.float32) + params["b1"]
  h = jnp.maximum(h, 0.0)
  y = jnp.dot(h.astype(jnp.bfloat16), params["w2"],
              preferred_element_type=jnp.float32) + params["b2"]
  return y.reshape(x.shape).astype(x.dtype)


def init_params(key, d_model, d_ff):
  k1, k2, k3, k4 = jax.random.split(key, 4)
  s = 0.1
  return {
      # MXU operands stored in bf16 (halves DMA bytes and VMEM residency).
      "w1": (s * jax.random.normal(k1, (d_model, d_ff), jnp.float32)).astype(jnp.bfloat16),
      "b1": (s * jax.random.normal(k3, (1, d_ff), jnp.float32)),
      "w2": (s * jax.random.normal(k2, (d_ff, d_model), jnp.float32)).astype(jnp.bfloat16),
      "b2": (s * jax.random.normal(k4, (1, d_model), jnp.float32)),
  }


if __name__ == "__main__":
  B, S, d_model, d_ff = 2, 8, 32, 64   # small toy shapes

  key = jax.random.PRNGKey(0)
  k_x, k_p = jax.random.split(key)
  x = jax.random.normal(k_x, (B, S, d_model), jnp.float32)
  params = init_params(k_p, d_model, d_ff)

  # block_rows=8 -> grid of 2 row steps even at this toy size (pipelining / megacore).
  out = positionwise_ffn_pallas(x, params, block_rows=8)
  out = jax.block_until_ready(out)

  ref = positionwise_ffn_ref(x, params)
  assert out.shape == x.shape
  assert jnp.allclose(out, ref, atol=5e-2, rtol=5e-2), "mismatch vs JAX reference"

  print("KERNEL_OK")
</pallas_src>

<mosaic_0001>
module attributes {stable_mosaic.version = 11 : i64} {
  func.func @_ffn_kernel(%arg0: i32, %arg1: memref<8x32xf32, #tpu.memory_space<vmem>>, %arg2: memref<32x64xbf16, #tpu.memory_space<vmem>>, %arg3: memref<1x64xf32, #tpu.memory_space<vmem>>, %arg4: memref<64x32xbf16, #tpu.memory_space<vmem>>, %arg5: memref<1x32xf32, #tpu.memory_space<vmem>>, %arg6: memref<8x32xf32, #tpu.memory_space<vmem>>) attributes {dimension_semantics = [#tpu.dimension_semantics<parallel>], iteration_bounds = array<i64: 2>, scalar_prefetch = 0 : i64, scratch_operands = 0 : i64, tpu.core_type = #tpu.core_type<tc>, window_params = [{transform_indices = @transform_0, window_bounds = array<i64: 8, 32>}, {pipeline_mode = #tpu.pipeline_mode<synchronous>, transform_indices = @transform_1, window_bounds = array<i64: 32, 64>}, {pipeline_mode = #tpu.pipeline_mode<synchronous>, transform_indices = @transform_2, window_bounds = array<i64: 1, 64>}, {pipeline_mode = #tpu.pipeline_mode<synchronous>, transform_indices = @transform_3, window_bounds = array<i64: 64, 32>}, {pipeline_mode = #tpu.pipeline_mode<synchronous>, transform_indices = @transform_4, window_bounds = array<i64: 1, 32>}, {transform_indices = @transform_5, window_bounds = array<i64: 8, 32>}]} {
    %c0 = arith.constant 0 : index
    %c0_0 = arith.constant 0 : index
    %0 = vector.load %arg1[%c0, %c0_0] : memref<8x32xf32, #tpu.memory_space<vmem>>, vector<8x32xf32>
    %1 = arith.truncf %0 : vector<8x32xf32> to vector<8x32xbf16>
    %c0_1 = arith.constant 0 : index
    %c0_2 = arith.constant 0 : index
    %2 = vector.load %arg2[%c0_1, %c0_2] : memref<32x64xbf16, #tpu.memory_space<vmem>>, vector<32x64xbf16>
    %cst = arith.constant dense<0.000000e+00> : vector<8x64xf32>
    %3 = tpu.matmul %1, %2, %cst {dimension_numbers = #tpu.dot_dimension_numbers<[1], [0], [0], [1], [0, 0, 1, 1], [], []>} : vector<8x32xbf16>, vector<32x64xbf16>, vector<8x64xf32> -> vector<8x64xf32>
    %c0_3 = arith.constant 0 : index
    %c0_4 = arith.constant 0 : index
    %4 = vector.load %arg3[%c0_3, %c0_4] : memref<1x64xf32, #tpu.memory_space<vmem>>, vector<1x64xf32>
    %5 = vector.broadcast %4 : vector<1x64xf32> to vector<8x64xf32>
    %6 = arith.addf %3, %5 : vector<8x64xf32>
    %cst_5 = arith.constant 0.000000e+00 : f32
    %7 = vector.broadcast %cst_5 : f32 to vector<8x64xf32>
    %8 = arith.maximumf %6, %7 : vector<8x64xf32>
    %9 = arith.truncf %8 : vector<8x64xf32> to vector<8x64xbf16>
    %c0_6 = arith.constant 0 : index
    %c0_7 = arith.constant 0 : index
    %10 = vector.load %arg4[%c0_6, %c0_7] : memref<64x32xbf16, #tpu.memory_space<vmem>>, vector<64x32xbf16>
    %cst_8 = arith.constant dense<0.000000e+00> : vector<8x32xf32>
    %11 = tpu.matmul %9, %10, %cst_8 {dimension_numbers = #tpu.dot_dimension_numbers<[1], [0], [0], [1], [0, 0, 1, 1], [], []>} : vector<8x64xbf16>, vector<64x32xbf16>, vector<8x32xf32> -> vector<8x32xf32>
    %c0_9 = arith.constant 0 : index
    %c0_10 = arith.constant 0 : index
    %12 = vector.load %arg5[%c0_9, %c0_10] : memref<1x32xf32, #tpu.memory_space<vmem>>, vector<1x32xf32>
    %13 = vector.broadcast %12 : vector<1x32xf32> to vector<8x32xf32>
    %14 = arith.addf %11, %13 : vector<8x32xf32>
    %c0_11 = arith.constant 0 : index
    %c0_12 = arith.constant 0 : index
    %15 = vector.load %arg6[%c0_11, %c0_12] : memref<8x32xf32, #tpu.memory_space<vmem>>, vector<8x32xf32>
    tpu.vector_store %arg6[%c0_11, %c0_12], %14 {strides = array<i32>} : memref<8x32xf32, #tpu.memory_space<vmem>>, vector<8x32xf32>,
    return
  }
  func.func @transform_0(%arg0: i32) -> (i32, i32) {
    %c0_i32 = arith.constant 0 : i32
    %c0_i32_0 = arith.constant 0 : i32
    return %arg0, %c0_i32 : i32, i32
  }
  func.func @transform_1(%arg0: i32) -> (i32, i32) {
    %c0_i32 = arith.constant 0 : i32
    %c0_i32_0 = arith.constant 0 : i32
    %c0_i32_1 = arith.constant 0 : i32
    return %c0_i32, %c0_i32_0 : i32, i32
  }
  func.func @transform_2(%arg0: i32) -> (i32, i32) {
    %c0_i32 = arith.constant 0 : i32
    %c0_i32_0 = arith.constant 0 : i32
    %c0_i32_1 = arith.constant 0 : i32
    return %c0_i32, %c0_i32_0 : i32, i32
  }
  func.func @transform_3(%arg0: i32) -> (i32, i32) {
    %c0_i32 = arith.constant 0 : i32
    %c0_i32_0 = arith.constant 0 : i32
    %c0_i32_1 = arith.constant 0 : i32
    return %c0_i32, %c0_i32_0 : i32, i32
  }
  func.func @transform_4(%arg0: i32) -> (i32, i32) {
    %c0_i32 = arith.constant 0 : i32
    %c0_i32_0 = arith.constant 0 : i32
    %c0_i32_1 = arith.constant 0 : i32
    return %c0_i32, %c0_i32_0 : i32, i32
  }
  func.func @transform_5(%arg0: i32) -> (i32, i32) {
    %c0_i32 = arith.constant 0 : i32
    %c0_i32_0 = arith.constant 0 : i32
    return %arg0, %c0_i32 : i32, i32
  }
}

</mosaic_0001>

<bundles_post_ra>
// kernel: tpu_custom_call.1
= control target key start
LH: loop header
LB: loop body
LE: loop exit
PB: predicated region body
PF: predicated region fallthrough
CT: control target
= control target key end

     0   :  { %10 = vsyncpa [#allocation3], 0  ;;  %s767_s0 = inlined_call_operand.vmem [shape: f32[16,32], index: 0, kind: input, shape index: {}]   ;;  %s768_s1 = inlined_call_operand.vmem [shape: bf16[32,64], index: 1, kind: input, shape index: {}]   ;;  %s769_s2 = inlined_call_operand.vmem [shape: f32[1,64], index: 2, kind: input, shape index: {}]   ;;  %s770_s3 = inlined_call_operand.vmem [shape: bf16[64,32], index: 3, kind: input, shape index: {}]   ;;  %s771_s4 = inlined_call_operand.vmem [shape: f32[1,32], index: 4, kind: input, shape index: {}]   ;;  %s772_s5 = inlined_call_operand.hbm [shape: f32[16,32], index: 5, kind: output, shape index: {}]  }
   0x1   :  { %12 = vsyncpa [#allocation3 + $0x1], 0  ;;  %s641_s18 = smov 0   ;;  %s643_s19 = smov 0  }
   0x2   :  { %s645_s20 = smov 0   ;;  %s647_s21 = smov 0  }
   0x3 LB: > { %s662_s22 = sadd.s32 4294967295, %s606_s21   ;;  %s449_s23 = sadd.s32 4294967294, %s606_s21   ;;  %s606_s21 = sphi %s647_s21, %s778_s21   ;;  %s602_s20 = sphi %s645_s20, %s777_s20   ;;  %s598_s19 = sphi %s643_s19, %s776_s19   ;;  %s594_s18 = sphi %s641_s18, %s775_s18  }
   0x4   : > { %s666_s24 = sadd.s32 1, %s606_s21   ;;  %s135_s25 = sadd.s32 1, %s602_s20 }
   0x5   : > { %s132_s26 = ssub.s32 %s606_s21, %s666_s24  ;;  %p145_p0 = scmp.ne.s32.totalorder %s602_s20, %s598_s19 }
   0x6   : > { %p133_p1 = scmp.eq.s32.totalorder %s132_s26, 0  ;;  %p146_p2 = scmp.eq.s32.totalorder %s662_s22, 1 }
   0x7   : > { %p151_p3 = scmp.ne.s32.totalorder %s598_s19, %s594_s18  ;;  %p152_p4 = scmp.eq.s32.totalorder %s449_s23, 1 }
   0x8   : > { %s677_s27 = scalar_select %p133_p1, %s602_s20, %s135_s25  }
   0x9   : > { %p679_p5 = por %p146_p2, %p145_p0  ;;  %p683_p6 = por %p152_p4, %p151_p3 }
   0xa   : > { %p452_p7 = scmp.ge.s32.totalorder %s606_s21, 1  ;;  %p189_p8 = scmp.lt.s32.totalorder %s606_s21, 3 }
   0xc   : > { %p190_p9 = pnand %p452_p7, %p189_p8 }
   0xd   : > { %v538_v0 = vld [vmem:[%s768_s1] sm:$0xff] (!%p190_p9)   ;;  %v608_v1 = vmov (!%p190_p9), 0.0   ;;  %v539_v2 = vld [vmem:[%s768_s1 + $0x8] sm:$0xff] (!%p190_p9)   ;;  %vm609_vm0 = vmmov (!%p190_p9), 0   ;;  %p216_p10 = scmp.lt.s32.totalorder (!%p190_p9), %s662_s22, 1  ;;  %vm246_vm1 = vcmask (!%p190_p9), 261120  }
   0xe   : > { %193 = sbr.rel (%p190_p9) target bundleno = 474 (0x1da), region = 40  ;;  %477 = vmatprep.subr.bf16.mxu0 (!%p190_p9), %v608_v1  ;;  %485 = vmatprep.subr.bf16.mxu1 (!%p190_p9), %v608_v1  ;;  %v540_v3 = vld [vmem:[%s770_s3] sm:$0xff] (!%p190_p9)   ;;  %v541_v4 = vld [vmem:[%s770_s3 + $0x8] sm:$0xff] (!%p190_p9)   ;;  %v542_v7 = vld [vmem:[%s770_s3 + $0x10] sm:$0xff] (!%p190_p9)   ;;  %vm331_vm2 = vcmask (!%p190_p9), 523264   ;;  %s213_s8 = sand.u32 (!%p190_p9), 1, %s598_s19  }
   0xf   : > { %478 = vmatpush3.bf16.msra.mxu0 (!%p190_p9), %v538_v0  ;;  %481 = vmatprep.mubr.msk.bf16.mxu0 (!%p190_p9), %vm609_vm0, %v608_v1  ;;  %v543_v8 = vld [vmem:[%s770_s3 + $0x18] sm:$0xff] (!%p190_p9)   ;;  %v455_v9 = vld [vmem:[%s769_s2] ss:$0 sm:$0xff] (!%p190_p9)  ;;  %s453_s9 = sshll.u32 (!%p190_p9), %s213_s8, 3  ;;  %s466_s12 = sshll.u32 (!%p190_p9), %s662_s22, 7 }
  0x10   : > { %479 = vmatprep.subr.bf16.mxu0 (!%p190_p9), %v608_v1  ;;  %493 = vmatprep.mubr.msk.bf16.mxu1 (!%p190_p9), %vm609_vm0, %v608_v1  ;;  %v459_v17 = vld [vmem:[%s771_s4] ss:$0 sm:$0xff] (!%p190_p9)  ;;  %s215_s13 = scalar_lea.vmem (!%p190_p9), [#allocation2], %s453_s9  ;;  %s610_s25 = smov (!%p190_p9), [#allocation2]  }
  0x11   : > { %486 = vmatpush3.bf16.msra.mxu1 (!%p190_p9), %v540_v3  ;;  %s548_s26 = sshll.u32 (!%p190_p9), %s610_s25, 4  ;;  %s549_s26 = int_to_ptr.vmem [resolvable:$false] %s548_s26 }
  0x12   : > { %487 = vmatprep.subr.bf16.mxu1 (!%p190_p9), %v608_v1  ;;  %s550_s30 = scalar_lea.vmem (!%p190_p9), %s549_s26, 256 }
  0x13   : > { %480 = vmatpush3.bf16.msra.mxu0 (!%p190_p9), %v539_v2 }
  0x15   : > { %s217_s11 = scalar_select %p216_p10, %s662_s22, 1  ;;  %488 = vmatpush3.bf16.msra.mxu1 %v541_v4 }
  0x16   : > { %489 = vmatprep.subr.bf16.mxu1 %v608_v1  ;;  %s377_s22 = scalar_lea.sflag [#allocation3], %s213_s8 }
  0x17   : > { %s454_s14 = sshll.u32 %s217_s11, 3 }
  0x18   : > { %s219_s17 = scalar_lea.vmem %s767_s0, %s454_s14  ;;  %s390_s14 = sshll.u32 %s215_s13, 4  ;;  %s726_s14 = int_to_ptr.vmem [resolvable:$true] %s390_s14 }
  0x19   : > { %v221_v5 = vld [vmem:[%s219_s17] sm:$0xff]  ;;  %490 = vmatpush3.bf16.msra.mxu1 %v542_v7  ;;  %s724_s17 = scalar_lea.hbm %s772_s5, %s466_s12  ;;  %s544_s23 = scalar_lea.vmem %s726_s14, 128 }
  0x1a   : > { %v222_v6 = vpack.c.bf16 %v221_v5, %v221_v5  ;;  %491 = vmatprep.subr.bf16.mxu1 %v608_v1  ;;  %p545_p11 = scmp.ne.s32.totalorder %s726_s14, %s544_s23  ;;  %p551_p0 = scmp.lt.s32.totalorder %s726_s14, %s549_s26 }
  0x1b   : > { %p552_p1 = scmp.lt.s32.totalorder %s550_s30, %s544_s23 }
  0x1c   : > { %482 = vmatmul.mubr.msk.bf16.vlgmr.msra.gmra.mrb[0].mxu0 %vm246_vm1, %v222_v6  ;;  %p546_p12 = pnand %p545_p11, %p679_p5 }
  0x1d   : > { %492 = vmatpush3.bf16.msra.mxu1 %v543_v8  ;;  %p553_p2 = por %p552_p1, %p551_p0 }
  0x1e   : > { %p547_p13 = pneg %p546_p12 }
  0x20   : > { %p554_p3 = pnand %p553_p2, %p547_p13 }
  0xef   : > { %v284_v10 = vpop.f32.mrb[0].mxu0 }
  0xf0   : > { %v285_v11 = vadd.f32 %v455_v9, %v284_v10  ;;  %v483_v12 = vpop.f32.mrb[1].mxu0 }
  0xf1   : > { %v287_v13 = vpop.f32.mrb[2].mxu0 }
  0xf2   : > { %v290_v14 = vmax.f32 %v285_v11, 0.0  ;;  %v484_v15 = vpop.f32.mrb[3].mxu0 }
  0xf4   : > { %v291_v16 = vpack.c.bf16 %v290_v14, %v290_v14 }
  0xf6   : > { %494 = vmatmul.mubr.msk.bf16.vlgmr.msra.gmra.mrb[0].mxu1 %vm331_vm2, %v291_v16 }
 0x1c9   : > { %v369_v18 = vpop.f32.mrb[0].mxu1 }
 0x1ca   : > { %v370_v19 = vadd.f32 %v459_v17, %v369_v18  ;;  %v495_v20 = vpop.f32.mrb[1].mxu1 }
 0x1cb   : > { %v372_v21 = vpop.f32.mrb[2].mxu1 }
 0x1cc   : > { %v496_v22 = vpop.f32.mrb[3].mxu1  ;;  %375 = vst.msk [vmem:[%s215_s13] sm:$0xff] %vm246_vm1, %v370_v19 }
 0x1cd   : > { %557 = shalt.err (!%p554_p3)
}
 0x1ce   : > { %s558_s6 = scalar_lea.hbm %s724_s17, 128  ;;  %s562_s9 = scalar_lea.hbm %s772_s5, 256 }
 0x1cf   : > { %p559_p4 = scmp.ne.s32.totalorder %s724_s17, %s558_s6  ;;  %p563_p9 = scmp.lt.u32.totalorder %s724_s17, %s772_s5 }
 0x1d0   : > { %p564_p10 = scmp.lt.u32.totalorder %s562_s9, %s558_s6  ;;  %p566_p12 = scmp.lt.u32.totalorder %s558_s6, %s724_s17 }
 0x1d1   : > { %p560_p7 = pnand %p559_p4, %p679_p5 }
 0x1d2   : > { %p565_p11 = por %p564_p10, %p563_p9 }
 0x1d3   : > { %p561_p8 = pneg %p560_p7 }
 0x1d4   : > { %p567_p13 = por %p566_p12, %p565_p11 }
 0x1d6   : > { %p568_p0 = pnand %p567_p13, %p561_p8 }
 0x1d8   : > { %571 = shalt.err (!%p568_p0)
}
 0x1d9   : > { %497 = dma.vmem_to_hbm [thread:$0]  (%p679_p5), %s726_s14, 128, %s724_s17, %s377_s22  }
 0x1da PF: > { %p503_p1 = scmp.ge.s32.totalorder %s606_s21, 2  ;;  %s402_s12 = sand.u32 1, %s594_s18  }
 0x1db   : > { %s403_s13 = scalar_lea.sflag [#allocation3], %s402_s12 }
 0x1dc   : > { %p500_p2 = pnand %p503_p1, %p683_p6 }
 0x1de   : > { %589 = dma.done.wait (!%p500_p2), %s403_s13, 128  }
 0x1df   : > { %591 = vsyncadd (!%p500_p2), %s403_s13, 4294967168  ;;  %p15_p3 = scmp.ge.s32.totalorder %s666_s24, 4   ;;  %s775_s18 = smov %s598_s19 }
 0x1e0   : > { %s776_s19 = smov %s602_s20  ;;  %s777_s20 = smov %s677_s27 }
 0x1e1   : > { %s778_s21 = smov %s666_s24  ;;  %17 = sbr.rel (!%p15_p3) target bundleno = 3 (0x3), region = 75 }
 0x1e8   :  { %408 = vsyncpa [#allocation3], 1 }
 0x1e9   :  { %410 = vsyncpa [#allocation3 + $0x1], 1 }

</bundles_post_ra>
